<compile_context>
chip_gen: v6e
topology: v6e:2x2x1
jax: 0.10.0
libtpu: 0.0.40
codegen_flags: <defaults>
</compile_context>

<pallas_src>
import functools

import jax
import jax.numpy as jnp
from jax.experimental import pallas as pl
from jax.experimental.pallas import tpu as pltpu


def _round_up(x, m):
    return ((x + m - 1) // m) * m


def _local_mi_kernel(f_ref, r_ref, o_ref, *, s_true, s_tile, needs_mask, inv_s):
    s = pl.program_id(1)

    @pl.when(s == 0)
    def _init():
        o_ref[...] = jnp.zeros_like(o_ref)

    f = f_ref[...].astype(jnp.float32)                      # (1, C, s_tile)
    r = r_ref[...].astype(jnp.float32)                      # (1, C, 1)

    dot = jnp.sum(f * r, axis=1, keepdims=True)             # (1, 1, s_tile)
    f_sq = jnp.sum(f * f, axis=1, keepdims=True)            # (1, 1, s_tile)

    if needs_mask:
        # Mask out zero-padded spatial positions in the last tile.
        lane = jax.lax.broadcasted_iota(jnp.int32, (1, 1, s_tile), 2)
        valid = (s * s_tile + lane) < s_true
        f_sq = jnp.where(valid, f_sq, 1.0)
        dot = jnp.where(valid, dot, 0.0)

    # Partial spatial sum of  dot * rsqrt(|f|^2)  (r-norm applied at finalize).
    o_ref[...] += jnp.sum(dot * jax.lax.rsqrt(f_sq), axis=2, keepdims=True)

    @pl.when(s == pl.num_programs(1) - 1)
    def _finalize():
        r_sq = jnp.sum(r * r, axis=1, keepdims=True)        # (1, 1, 1)
        o_ref[...] = o_ref[...] * (jax.lax.rsqrt(r_sq) * inv_s)


def local_mi(features, representation, *, s_tile=2048):
    """Pallas equivalent of LocalMI.forward.

    features:       (B, C, W, H)
    representation: (B, C)
    returns:        (B,)  (same dtype as features)
    """
    B, C, W, H = features.shape
    S = W * H

    f = features.reshape(B, C, S)                 # keep native dtype (no upcast)
    r = representation.reshape(B, C, 1)

    # Spatial tile: multiple of 128 lanes, capped by a per-buffer VMEM budget
    # (features tile is double-buffered by the pipeline) and by the problem size.
    itemsize = jnp.dtype(f.dtype).itemsize
    budget = 8 * 1024 * 1024                      # bytes for the double-buffered tile pair
    max_lanes = max(128, (budget // (2 * C * itemsize)) // 128 * 128)
    tile = int(min(s_tile, max_lanes, _round_up(S, 128)))
    tile = max(128, (tile // 128) * 128)

    S_pad = _round_up(S, tile)
    if S_pad != S:
        f = jnp.pad(f, ((0, 0), (0, 0), (0, S_pad - S)))
    needs_mask = S_pad != S

    grid = (B, S_pad // tile)

    kernel = functools.partial(
        _local_mi_kernel,
        s_true=S, s_tile=tile, needs_mask=needs_mask, inv_s=1.0 / S)

    out = pl.pallas_call(
        kernel,
        out_shape=jax.ShapeDtypeStruct((B, 1, 1), jnp.float32),
        grid=grid,
        in_specs=[
            pl.BlockSpec((1, C, tile), lambda b, s: (b, 0, s)),
            pl.BlockSpec((1, C, 1), lambda b, s: (b, 0, 0)),
        ],
        out_specs=pl.BlockSpec((1, 1, 1), lambda b, s: (b, 0, 0)),
        compiler_params=pltpu.CompilerParams(
            dimension_semantics=("parallel", "arbitrary"),
            vmem_limit_bytes=32 * 1024 * 1024,
        ),
    )(f, r)
    return out[:, 0, 0].astype(features.dtype)


def local_mi_ref(features, representation):
    """Pure-JAX reference mirroring the PyTorch forward."""
    rep = representation[:, :, None, None]
    f_norm = jnp.sqrt(jnp.sum(features * features, axis=1, keepdims=True))
    r_norm = jnp.sqrt(jnp.sum(rep * rep, axis=1, keepdims=True))
    cos = jnp.sum((features / f_norm) * (rep / r_norm), axis=1)   # (B, W, H)
    return cos.mean(axis=(1, 2))                                  # (B,)


if __name__ == "__main__":
    key = jax.random.PRNGKey(0)
    k1, k2, k3, k4 = jax.random.split(key, 4)

    # Primary case (spatial size is a multiple of 128).
    B, C, W, H = 2, 4, 16, 16
    features = jax.random.normal(k1, (B, C, W, H), dtype=jnp.float32)
    representation = jax.random.normal(k2, (B, C), dtype=jnp.float32)

    out = local_mi(features, representation)
    jax.block_until_ready(out)
    ref = local_mi_ref(features, representation)
    assert out.shape == (B,)
    assert jnp.allclose(out, ref, atol=2e-5, rtol=1e-4), (out, ref)

    # Ragged spatial size (exercises the zero-padded, masked last tile).
    f2 = jax.random.normal(k3, (2, 4, 5, 7), dtype=jnp.float32)
    r2 = jax.random.normal(k4, (2, 4), dtype=jnp.float32)
    out2 = local_mi(f2, r2)
    jax.block_until_ready(out2)
    ref2 = local_mi_ref(f2, r2)
    assert jnp.allclose(out2, ref2, atol=2e-5, rtol=1e-4), (out2, ref2)

    print("KERNEL_OK")
</pallas_src>

<mosaic_0001>
module attributes {stable_mosaic.version = 11 : i64} {
  func.func @_local_mi_kernel(%arg0: i32, %arg1: i32, %arg2: memref<1x4x256xf32, #tpu.memory_space<vmem>>, %arg3: memref<1x4x1xf32, #tpu.memory_space<vmem>>, %arg4: memref<1x1x1xf32, #tpu.memory_space<vmem>>) attributes {dimension_semantics = [#tpu.dimension_semantics<parallel>, #tpu.dimension_semantics<arbitrary>], iteration_bounds = array<i64: 2, 1>, scalar_prefetch = 0 : i64, scratch_operands = 0 : i64, tpu.core_type = #tpu.core_type<tc>, window_params = [{transform_indices = @transform_0, window_bounds = array<i64: 1, 4, 256>}, {transform_indices = @transform_1, window_bounds = array<i64: 1, 4, 1>}, {transform_indices = @transform_2, window_bounds = array<i64: 1, 1, 1>}]} {
    %c0_i32 = arith.constant 0 : i32
    %0 = arith.cmpi eq, %arg1, %c0_i32 : i32
    %1 = arith.extui %0 : i1 to i32
    %c0_i32_0 = arith.constant 0 : i32
    %2 = arith.cmpi ne, %1, %c0_i32_0 : i32
    scf.if %2 {
      %cst_16 = arith.constant 0.000000e+00 : f32
      %22 = vector.broadcast %cst_16 : f32 to vector<1x1x1xf32>
      %c0_17 = arith.constant 0 : index
      %c0_18 = arith.constant 0 : index
      %c0_19 = arith.constant 0 : index
      %23 = vector.load %arg4[%c0_17, %c0_18, %c0_19] : memref<1x1x1xf32, #tpu.memory_space<vmem>>, vector<1x1x1xf32>
      tpu.vector_store %arg4[%c0_17, %c0_18, %c0_19], %22 {strides = array<i32>} : memref<1x1x1xf32, #tpu.memory_space<vmem>>, vector<1x1x1xf32>,
    } else {
    }
    %c0 = arith.constant 0 : index
    %c0_1 = arith.constant 0 : index
    %c0_2 = arith.constant 0 : index
    %3 = vector.load %arg2[%c0, %c0_1, %c0_2] : memref<1x4x256xf32, #tpu.memory_space<vmem>>, vector<1x4x256xf32>
    %c0_3 = arith.constant 0 : index
    %c0_4 = arith.constant 0 : index
    %c0_5 = arith.constant 0 : index
    %4 = vector.load %arg3[%c0_3, %c0_4, %c0_5] : memref<1x4x1xf32, #tpu.memory_space<vmem>>, vector<1x4x1xf32>
    %5 = vector.broadcast %4 : vector<1x4x1xf32> to vector<1x4x256xf32>
    %6 = arith.mulf %3, %5 : vector<1x4x256xf32>
    %cst = arith.constant dense<0.000000e+00> : vector<1x256xf32>
    %7 = vector.multi_reduction <add>, %6, %cst [1] : vector<1x4x256xf32> to vector<1x256xf32>
    %8 = vector.shape_cast %7 : vector<1x256xf32> to vector<1x1x256xf32>
    %9 = arith.mulf %3, %3 : vector<1x4x256xf32>
    %cst_6 = arith.constant dense<0.000000e+00> : vector<1x256xf32>
    %10 = vector.multi_reduction <add>, %9, %cst_6 [1] : vector<1x4x256xf32> to vector<1x256xf32>
    %11 = vector.shape_cast %10 : vector<1x256xf32> to vector<1x1x256xf32>
    %c0_7 = arith.constant 0 : index
    %c0_8 = arith.constant 0 : index
    %c0_9 = arith.constant 0 : index
    %12 = vector.load %arg4[%c0_7, %c0_8, %c0_9] : memref<1x1x1xf32, #tpu.memory_space<vmem>>, vector<1x1x1xf32>
    %13 = math.rsqrt %11 : vector<1x1x256xf32>
    %14 = arith.mulf %8, %13 : vector<1x1x256xf32>
    %cst_10 = arith.constant dense<0.000000e+00> : vector<1x1xf32>
    %15 = vector.multi_reduction <add>, %14, %cst_10 [2] : vector<1x1x256xf32> to vector<1x1xf32>
    %16 = vector.shape_cast %15 : vector<1x1xf32> to vector<1x1x1xf32>
    %17 = arith.addf %12, %16 : vector<1x1x1xf32>
    %c0_11 = arith.constant 0 : index
    %c0_12 = arith.constant 0 : index
    %c0_13 = arith.constant 0 : index
    %18 = vector.load %arg4[%c0_11, %c0_12, %c0_13] : memref<1x1x1xf32, #tpu.memory_space<vmem>>, vector<1x1x1xf32>
    tpu.vector_store %arg4[%c0_11, %c0_12, %c0_13], %17 {strides = array<i32>} : memref<1x1x1xf32, #tpu.memory_space<vmem>>, vector<1x1x1xf32>,
    %c0_i32_14 = arith.constant 0 : i32
    %19 = arith.cmpi eq, %arg1, %c0_i32_14 : i32
    %20 = arith.extui %19 : i1 to i32
    %c0_i32_15 = arith.constant 0 : i32
    %21 = arith.cmpi ne, %20, %c0_i32_15 : i32
    scf.if %21 {
      %22 = arith.mulf %4, %4 : vector<1x4x1xf32>
      %cst_16 = arith.constant dense<0.000000e+00> : vector<1x1xf32>
      %23 = vector.multi_reduction <add>, %22, %cst_16 [1] : vector<1x4x1xf32> to vector<1x1xf32>
      %24 = vector.shape_cast %23 : vector<1x1xf32> to vector<1x1x1xf32>
      %c0_17 = arith.constant 0 : index
      %c0_18 = arith.constant 0 : index
      %c0_19 = arith.constant 0 : index
      %25 = vector.load %arg4[%c0_17, %c0_18, %c0_19] : memref<1x1x1xf32, #tpu.memory_space<vmem>>, vector<1x1x1xf32>
      %26 = math.rsqrt %24 : vector<1x1x1xf32>
      %cst_20 = arith.constant 3.906250e-03 : f32
      %27 = vector.broadcast %cst_20 : f32 to vector<1x1x1xf32>
      %28 = arith.mulf %26, %27 : vector<1x1x1xf32>
      %29 = arith.mulf %25, %28 : vector<1x1x1xf32>
      %c0_21 = arith.constant 0 : index
      %c0_22 = arith.constant 0 : index
      %c0_23 = arith.constant 0 : index
      %30 = vector.load %arg4[%c0_21, %c0_22, %c0_23] : memref<1x1x1xf32, #tpu.memory_space<vmem>>, vector<1x1x1xf32>
      tpu.vector_store %arg4[%c0_21, %c0_22, %c0_23], %29 {strides = array<i32>} : memref<1x1x1xf32, #tpu.memory_space<vmem>>, vector<1x1x1xf32>,
    } else {
    }
    return
  }
  func.func @transform_0(%arg0: i32, %arg1: i32) -> (i32, i32, i32) {
    %c0_i32 = arith.constant 0 : i32
    %c0_i32_0 = arith.constant 0 : i32
    return %arg0, %c0_i32, %arg1 : i32, i32, i32
  }
  func.func @transform_1(%arg0: i32, %arg1: i32) -> (i32, i32, i32) {
    %c0_i32 = arith.constant 0 : i32
    %c0_i32_0 = arith.constant 0 : i32
    %c0_i32_1 = arith.constant 0 : i32
    return %arg0, %c0_i32, %c0_i32_0 : i32, i32, i32
  }
  func.func @transform_2(%arg0: i32, %arg1: i32) -> (i32, i32, i32) {
    %c0_i32 = arith.constant 0 : i32
    %c0_i32_0 = arith.constant 0 : i32
    %c0_i32_1 = arith.constant 0 : i32
    return %arg0, %c0_i32, %c0_i32_0 : i32, i32, i32
  }
}

</mosaic_0001>

<bundles_post_ra>
// kernel: tpu_custom_call.1
= control target key start
LH: loop header
LB: loop body
LE: loop exit
PB: predicated region body
PF: predicated region fallthrough
CT: control target
= control target key end

     0   :  { %7 = vsyncpa [#allocation3], 0  ;;  %s653_s0 = inlined_call_operand.hbm [shape: f32[2,4,256], index: 0, kind: input, shape index: {}]   ;;  %s654_s1 = inlined_call_operand.vmem [shape: f32[2,4,1], index: 1, kind: input, shape index: {}]   ;;  %s655_s2 = inlined_call_operand.vmem [shape: f32[2,1,1], index: 2, kind: output, shape index: {}]  }
   0x1   :  { %9 = vsyncpa [#allocation3 + $0x1], 0  ;;  %s536_s9 = smov 0   ;;  %s538_s10 = smov 0  }
   0x2   :  { %s540_s11 = smov 0   ;;  %s542_s12 = smov 0  }
   0x3   :  { %s544_s13 = smov 0   ;;  %s546_s14 = smov 0  }
   0x4 LB: > { %s359_s15 = sadd.s32 4294967295, %s515_s14   ;;  %s27_s16 = sadd.s32 1, %s511_s13  ;;  %s515_s14 = sphi %s546_s14, %s15_s14   ;;  %s511_s13 = sphi %s544_s13, %s663_s13   ;;  %s507_s12 = sphi %s542_s12, %s662_s12   ;;  %s503_s11 = sphi %s540_s11, %s661_s11   ;;  %s499_s10 = sphi %s538_s10, %s660_s10   ;;  %s495_s9 = sphi %s536_s9, %s659_s9  }
   0x5   : > { %p29_p0 = scmp.ge.s32.totalorder %s27_s16, 2  ;;  %s36_s17 = sadd.s32 1, %s503_s11 }
   0x6   : > { %p43_p1 = scmp.ne.s32.totalorder %s503_s11, %s499_s10  ;;  %p44_p2 = scmp.eq.s32.totalorder %s515_s14, 0 }
   0x7   : > { %s665_s16 = smov (%p29_p0, %s27_s16), 0  ;;  %p49_p4 = scmp.ne.s32.totalorder %s499_s10, %s495_s9 }
   0x8   : > { %p572_p3 = por %p44_p2, %p43_p1  ;;  %s31_s19 = ssub.s32 %s511_s13, %s665_s16 }
   0x9   : > { %p50_p5 = scmp.eq.s32.totalorder %s359_s15, 0  ;;  %p34_p6 = scmp.eq.s32.totalorder %s31_s19, 0 }
   0xa   : > { %p378_p8 = scmp.lt.s32.totalorder %s515_s14, 2  ;;  %s125_s22 = sand.u32 1, %s503_s11  }
   0xb   : > { %p579_p7 = por %p50_p5, %p49_p4  ;;  %s371_s23 = sshll.u32 %s511_s13, 7 }
   0xc   : > { %s585_s21 = scalar_select %p34_p6, %s503_s11, %s36_s17  }
   0xd   : > { %s363_s24 = sshll.u32 %s125_s22, 3  ;;  %s137_s27 = scalar_lea.hbm %s653_s0, %s371_s23 }
   0xe   : > { %s129_s28 = scalar_lea.vmem [#allocation2], %s363_s24  ;;  %p594_p9 = pnand %p378_p8, %p572_p3 }
   0xf   : > { %s139_s29 = sshll.u32 %s129_s28, 4  ;;  %p366_p10 = scmp.ge.s32.totalorder %s515_s14, 1  ;;  %s140_s29 = int_to_ptr.vmem [resolvable:$true] %s139_s29 }
  0x10   : > { %p151_p11 = scmp.lt.s32.totalorder %s515_s14, 3  ;;  %s126_s3 = scalar_lea.sflag [#allocation3], %s125_s22 }
  0x11   : > { %p439_p12 = pneg %p594_p9  ;;  %s450_s4 = scalar_lea.vmem %s140_s29, 128 }
  0x12   : > { %p451_p13 = scmp.ne.s32.totalorder %s140_s29, %s450_s4  ;;  %s517_s5 = smov [#allocation2]  }
  0x13   : > { %s455_s6 = sshll.u32 %s517_s5, 4  ;;  %s456_s6 = int_to_ptr.vmem [resolvable:$false] %s455_s6 }
  0x14   : > { %p453_p0 = pnand %p451_p13, %p439_p12  ;;  %s457_s7 = scalar_lea.vmem %s456_s6, 256 }
  0x15   : > { %p458_p2 = scmp.lt.s32.totalorder %s140_s29, %s456_s6  ;;  %p459_p3 = scmp.lt.s32.totalorder %s457_s7, %s450_s4 }
  0x16   : > { %p454_p1 = pneg %p453_p0 }
  0x17   : > { %p460_p4 = por %p459_p3, %p458_p2 }
  0x19   : > { %p461_p5 = pnand %p460_p4, %p454_p1 }
  0x1b   : > { %464 = shalt.err (!%p461_p5)
}
  0x1c   : > { %377 = dma.hbm_to_vmem [thread:$0]  (!%p594_p9), %s137_s27, 128, %s140_s29, %s126_s3  }
  0x1d   : > { %p152_p6 = pnand %p366_p10, %p151_p11 }
  0x1e   : > { %s157_s8 = sand.u32 (!%p152_p6), 1, %s499_s10  }
  0x1f   : > { %155 = sbr.rel (%p152_p6) target bundleno = 341 (0x155), region = 28  ;;  %s367_s9 = sshll.u32 (!%p152_p6), %s157_s8, 3 }
  0x20   : > { %s158_s15 = scalar_lea.sflag (!%p152_p6), [#allocation3], %s157_s8  ;;  %s161_s17 = scalar_lea.vmem (!%p152_p6), [#allocation2], %s367_s9 }
  0x24   : > { %490 = dma.done.wait (%p579_p7), %s158_s15, 128  }
  0x25   : > { %492 = vsyncadd (%p579_p7), %s158_s15, 4294967168  ;;  %p185_p8 = scmp.lt.s32.totalorder %s507_s12, 1  ;;  %v518_v0 = vmov 0   ;;  %vm196_vm0 = vcmask 0   ;;  %v519_v1 = vmov 0.0   ;;  %v198_v3 = vld [vmem:[%s161_s17] sm:$0xff]  ;;  %v207_v16 = vlaneseq }
  0x26   : > { %430 = vset.pattern.permute.xlu0 %v518_v0  ;;  %v231_v4 = vmul.f32 %v198_v3, %v198_v3  ;;  %vm216_vm1 = vcmask 1043456   ;;  %v520_v14 = vmov 839922192   ;;  %vm264_vm2 = vcmask 3072  }
  0x27   : > { %s667_s12 = smov (!%p185_p8, %s507_s12), 1  ;;  %v205_v15 = vunpack.c.l.s4 %v520_v14  ;;  %v208_v20 = vshrl.u32 %v207_v16, 7 }
  0x28   : > { %s368_s18 = sshll.u32 %s667_s12, 2  ;;  %s618_s23 = scalar_lea.vmem %s655_s2, %s667_s12  ;;  %v233_v5 = vcombine.high %v231_v4, %v231_v4  ;;  %v235_v6 = vsel %vm216_vm1, %v231_v4, 0.0 }
  0x29   : > { %s188_s26 = scalar_lea.vmem %s654_s1, %s368_s18  ;;  %197 = vst.msk [vmem:[%s618_s23] sm:$0x1] %vm196_vm0, %v519_v1  ;;  %v236_v8 = vrot.slane %v235_v6, 4  ;;  %v206_v19 = vunpack.c.0.s8 %v205_v15 }
  0x2a   : > { %v199_v2 = vld [vmem:[%s188_s26] sm:$0xf]  ;;  %v242_v7 = vsel %vm216_vm1, %v233_v5, 0.0 }
  0x2b   : > { %202 = vperm.xlu0 %430, %v199_v2   ;;  %v243_v9 = vrot.slane %v242_v7, 4  ;;  %v237_v10 = vadd.f32 %v236_v8, %v235_v6  ;;  %v209_v23 = vsub.s32 %v206_v19, %v208_v20  ;;  %v263_v49 = vmul.f32 %v199_v2, %v199_v2 }
  0x2d   : > { %v244_v11 = vadd.f32 %v243_v9, %v242_v7  ;;  %v238_v12 = vrot.slane %v237_v10, 2  ;;  %v265_v50 = vsel %vm264_vm2, %v263_v49, 0.0 }
  0x2e   : > { %v266_v51 = vrot.slane %v265_v50, 4 }
  0x2f   : > { %v245_v13 = vrot.slane %v244_v11, 2  ;;  %v239_v17 = vadd.f32 %v238_v12, %v237_v10 }
  0x30   : > { %v267_v52 = vadd.f32 %v266_v51, %v265_v50  ;;  %v249_v57 = vld [vmem:[%s618_s23] sm:$0x1] }
  0x31   : > { %v246_v18 = vadd.f32 %v245_v13, %v244_v11  ;;  %v240_v21 = vrot.slane %v239_v17, 1 }
  0x32   : > { %v268_v53 = vrot.slane %v267_v52, 2 }
  0x33   : > { %v247_v22 = vrot.slane %v246_v18, 1  ;;  %v241_v24 = vadd.f32 %v240_v21, %v239_v17 }
  0x34   : > { %v269_v54 = vadd.f32 %v268_v53, %v267_v52 }
  0x35   : > { %v248_v26 = vadd.f32 %v247_v22, %v246_v18  ;;  %431 = vrsqrt.f32 %v241_v24 }
  0x36   : > { %v270_v55 = vrot.slane %v269_v54, 1 }
  0x37   : > { %433 = vrsqrt.f32 %v248_v26 }
  0x38   : > { %v271_v56 = vadd.f32 %v270_v55, %v269_v54 }
  0x3a   : > { %435 = vrsqrt.f32 %v271_v56 }
  0x42   : > { %v432_v41 = vpop.eup %431 }
  0x44   : > { %v434_v44 = vpop.eup %433 }
  0x47   : > { %v436_v60 = vpop.eup %435 }
  0x48   : > { %v274_v61 = vmul.f32 0.00390625, %v436_v60 }
  0xa6   : > { %v203_v25 = vpop.permute.xlu0 %202 }
  0xa7   : > { %v210_v27 = vrot.slane %v203_v25, %v209_v23 }
  0xa9   : > { %v212_v28 = vmul.f32 %v210_v27, %v198_v3 }
  0xab   : > { %v214_v29 = vcombine.high %v212_v28, %v212_v28  ;;  %v217_v30 = vsel %vm216_vm1, %v212_v28, 0.0 }
  0xac   : > { %v218_v31 = vrot.slane %v217_v30, 4 }
  0xad   : > { %v224_v32 = vsel %vm216_vm1, %v214_v29, 0.0 }
  0xae   : > { %v219_v33 = vadd.f32 %v218_v31, %v217_v30  ;;  %v225_v34 = vrot.slane %v224_v32, 4 }
  0xb0   : > { %v220_v35 = vrot.slane %v219_v33, 2  ;;  %v226_v36 = vadd.f32 %v225_v34, %v224_v32 }
  0xb2   : > { %v221_v37 = vadd.f32 %v220_v35, %v219_v33  ;;  %v227_v38 = vrot.slane %v226_v36, 2 }
  0xb4   : > { %v222_v39 = vrot.slane %v221_v37, 1  ;;  %v228_v40 = vadd.f32 %v227_v38, %v226_v36 }
  0xb6   : > { %v223_v42 = vadd.f32 %v222_v39, %v221_v37  ;;  %v229_v43 = vrot.slane %v228_v40, 1 }
  0xb8   : > { %v230_v45 = vadd.f32 %v229_v43, %v228_v40  ;;  %v252_v46 = vmul.f32 %v432_v41, %v223_v42 }
  0xba   : > { %v253_v47 = vmul.f32 %v434_v44, %v230_v45 }
  0xbc   : > { %v254_v48 = vadd.f32 %v253_v47, %v252_v46 }
  0xbe   : > { %255 = vadd.xlane.f32.xlu0 %v254_v48 }
 0x147   : > { %v256_v58 = vpop.xlane.xlu0 %255 }
 0x148   : > { %v257_v59 = vadd.f32 %v256_v58, %v249_v57 }
 0x14a   : > { %259 = vst.msk [vmem:[%s618_s23] sm:$0x1] %vm196_vm0, %v257_v59 }
 0x151   : > { %v272_v62 = vld [vmem:[%s618_s23] sm:$0x1] }
 0x152   : > { %v275_v63 = vmul.f32 %v274_v61, %v272_v62 }
 0x154   : > { %276 = vst.msk [vmem:[%s618_s23] sm:$0x1] %vm196_vm0, %v275_v63 }
 0x155 PF: > { %s15_s14 = sadd.s32 1, %s515_s14   ;;  %s659_s9 = smov %s499_s10 }
 0x156   : > { %p12_p7 = scmp.ge.s32.totalorder %s15_s14, 4   ;;  %s660_s10 = smov %s503_s11 }
 0x157   : > { %s661_s11 = smov %s585_s21  ;;  %s662_s12 = smov %s511_s13 }
 0x158   : > { %s663_s13 = smov %s665_s16  ;;  %14 = sbr.rel (!%p12_p7) target bundleno = 4 (0x4), region = 79 }
 0x15d   :  { %294 = vsyncpa [#allocation3], 1 }
 0x15e   :  { %296 = vsyncpa [#allocation3 + $0x1], 1 }

</bundles_post_ra>
